<compile_context>
chip_gen: v6e
topology: v6e:2x2x1
jax: 0.10.0
libtpu: 0.0.40
codegen_flags: <defaults>
</compile_context>

<pallas_src>
import jax
import jax.numpy as jnp
import numpy as np
from jax import lax
from jax.experimental import pallas as pl
from jax.experimental.pallas import tpu as pltpu

SMOOTH = 1.0
W_CE = 0.5
W_DICE = 0.5

# TODO(synk): mmseg ignore_index / class_weight / avg_non_ignore options are
# not modeled (matches the plain softmax-CE + dice reference below).


def _multi_loss_kernel(logits_ref, target_ref, ce_ref, inter_ref, den_ref):
    # logits_ref: (1, C, T) f32      target_ref: (1, 1, T) int32
    # ce_ref / inter_ref / den_ref: (1, C, 1) f32 per-sample accumulators,
    # resident across the HW-tile ('arbitrary') grid axis.
    j = pl.program_id(1)

    @pl.when(j == 0)
    def _():
        ce_ref[...] = jnp.zeros_like(ce_ref)
        inter_ref[...] = jnp.zeros_like(inter_ref)
        den_ref[...] = jnp.zeros_like(den_ref)

    logits = logits_ref[0].astype(jnp.float32)           # (C, T)
    c, t = logits.shape
    tgt = target_ref[0]                                  # (1, T) int32

    # one-hot along the class (sublane) axis: pure broadcast compare against
    # the lane-major target -- no lane<->sublane relayout.
    class_iota = lax.broadcasted_iota(jnp.int32, (c, t), 0)
    t1h = (class_iota == tgt).astype(jnp.float32)        # (C, T)

    # numerically stable softmax / log-softmax over classes (sublane reduces)
    m = jnp.max(logits, axis=0, keepdims=True)           # (1, T)
    e = jnp.exp(logits - m)                              # (C, T)
    s = jnp.sum(e, axis=0, keepdims=True)                # (1, T)
    logp = logits - m - jnp.log(s)                       # (C, T)
    # exact reciprocal keeps the dice path within 1e-5 of the reference;
    # pl.reciprocal(s, approx=True) would shift this work to the EUP slot.
    p = e * pl.reciprocal(s, approx=False)               # (C, T)

    # per-class partial statistics for this tile (lane-axis reductions),
    # accumulated into the per-sample resident output blocks.
    ce_ref[0] += jnp.sum(t1h * (-logp), axis=-1, keepdims=True)    # (C, 1)
    inter_ref[0] += jnp.sum(p * t1h, axis=-1, keepdims=True)       # (C, 1)
    # t1h is 0/1, so sum(t1h^2) == sum(t1h): fold the count into the denom
    # and save a full-tile multiply.
    den_ref[0] += jnp.sum(p * p + t1h, axis=-1, keepdims=True)     # (C, 1)


def _pick_hw_tile(hw):
    """Largest lane-multiple tile (<= 8192) that divides HW; else full HW."""
    if hw % 128 != 0:
        return hw  # full-extent block (allowed when equal to the array dim)
    for t in (8192, 4096, 2048, 1024, 512, 256, 128):
        if hw % t == 0:
            return t
    return hw


def multi_loss(pred_nchw, target_nhw):
    """pred_nchw: f32 [N, C, H, W] logits; target_nhw: int [N, H, W]."""
    n, c, h, w = pred_nchw.shape
    hw = h * w
    t = _pick_hw_tile(hw)

    logits = pred_nchw.reshape(n, c, hw).astype(jnp.float32)   # free reshape
    target = target_nhw.reshape(n, 1, hw).astype(jnp.int32)

    out_stat = jax.ShapeDtypeStruct((n, c, 1), jnp.float32)
    stat_spec = pl.BlockSpec((1, c, 1), lambda i, j: (i, 0, 0))

    ce_c, inter_c, den_c = pl.pallas_call(
        _multi_loss_kernel,
        out_shape=(out_stat, out_stat, out_stat),
        grid_spec=pltpu.PrefetchScalarGridSpec(
            num_scalar_prefetch=0,
            grid=(n, hw // t),
            in_specs=[
                pl.BlockSpec((1, c, t), lambda i, j: (i, 0, j)),
                pl.BlockSpec((1, 1, t), lambda i, j: (i, 0, j)),
            ],
            out_specs=(stat_spec, stat_spec, stat_spec),
        ),
        compiler_params=pltpu.CompilerParams(
            dimension_semantics=("parallel", "arbitrary")),
    )(logits, target)

    # tiny epilogue in plain JAX: weighted combine of the two losses.
    ce_c = ce_c[..., 0]          # (N, C)
    inter_c = inter_c[..., 0]    # (N, C)
    den_c = den_c[..., 0]        # (N, C)

    ce_mean = jnp.sum(ce_c) / jnp.float32(n * hw)
    dice = 1.0 - (2.0 * inter_c + SMOOTH) / (den_c + SMOOTH)   # (N, C)
    dice_mean = jnp.mean(dice)   # mean over classes, then over batch
    return W_CE * ce_mean + W_DICE * dice_mean


def multi_loss_ref(pred_nchw, target_nhw):
    """Pure-JAX reference reproducing the PyTorch semantics."""
    n, c, h, w = pred_nchw.shape
    logits = jnp.transpose(pred_nchw, (0, 2, 3, 1)).reshape(n, h * w, c)
    logits = logits.astype(jnp.float32)
    tgt = target_nhw.reshape(n, h * w)
    logp = jax.nn.log_softmax(logits, axis=-1)
    p = jax.nn.softmax(logits, axis=-1)
    t1h = jax.nn.one_hot(tgt, c, dtype=jnp.float32)
    ce = jnp.mean(-jnp.sum(t1h * logp, axis=-1))
    num = 2.0 * jnp.sum(p * t1h, axis=1) + SMOOTH
    den = jnp.sum(p ** 2 + t1h ** 2, axis=1) + SMOOTH
    dice = jnp.mean(jnp.mean(1.0 - num / den, axis=-1))
    return W_CE * ce + W_DICE * dice


if __name__ == "__main__":
    key = jax.random.PRNGKey(0)
    k1, k2 = jax.random.split(key)
    N, C, H, W = 2, 4, 16, 16
    pred = jax.random.normal(k1, (N, C, H, W), dtype=jnp.float32)
    target = jax.random.randint(k2, (N, H, W), 0, C, dtype=jnp.int32)

    out = jax.block_until_ready(multi_loss(pred, target))
    ref = jax.block_until_ready(multi_loss_ref(pred, target))

    assert np.allclose(np.asarray(out), np.asarray(ref), rtol=1e-5, atol=1e-5), (
        f"mismatch: pallas={out}, ref={ref}")
    print("KERNEL_OK")
</pallas_src>

<mosaic_0001>
module attributes {stable_mosaic.version = 11 : i64} {
  func.func @_multi_loss_kernel(%arg0: i32, %arg1: i32, %arg2: memref<1x4x256xf32, #tpu.memory_space<vmem>>, %arg3: memref<1x1x256xi32, #tpu.memory_space<vmem>>, %arg4: memref<1x4x1xf32, #tpu.memory_space<vmem>>, %arg5: memref<1x4x1xf32, #tpu.memory_space<vmem>>, %arg6: memref<1x4x1xf32, #tpu.memory_space<vmem>>) attributes {dimension_semantics = [#tpu.dimension_semantics<parallel>, #tpu.dimension_semantics<arbitrary>], iteration_bounds = array<i64: 2, 1>, scalar_prefetch = 0 : i64, scratch_operands = 0 : i64, tpu.core_type = #tpu.core_type<tc>, window_params = [{transform_indices = @transform_0, window_bounds = array<i64: 1, 4, 256>}, {transform_indices = @transform_1, window_bounds = array<i64: 1, 1, 256>}, {transform_indices = @transform_2, window_bounds = array<i64: 1, 4, 1>}, {transform_indices = @transform_3, window_bounds = array<i64: 1, 4, 1>}, {transform_indices = @transform_4, window_bounds = array<i64: 1, 4, 1>}]} {
    %c0_i32 = arith.constant 0 : i32
    %0 = arith.cmpi eq, %arg1, %c0_i32 : i32
    %1 = arith.extui %0 : i1 to i32
    %c0_i32_0 = arith.constant 0 : i32
    %2 = arith.cmpi ne, %1, %c0_i32_0 : i32
    scf.if %2 {
      %cst_29 = arith.constant 0.000000e+00 : f32
      %57 = vector.broadcast %cst_29 : f32 to vector<1x4x1xf32>
      %c0_30 = arith.constant 0 : index
      %c0_31 = arith.constant 0 : index
      %c0_32 = arith.constant 0 : index
      %58 = vector.load %arg4[%c0_30, %c0_31, %c0_32] : memref<1x4x1xf32, #tpu.memory_space<vmem>>, vector<1x4x1xf32>
      tpu.vector_store %arg4[%c0_30, %c0_31, %c0_32], %57 {strides = array<i32>} : memref<1x4x1xf32, #tpu.memory_space<vmem>>, vector<1x4x1xf32>,
      %cst_33 = arith.constant 0.000000e+00 : f32
      %59 = vector.broadcast %cst_33 : f32 to vector<1x4x1xf32>
      %c0_34 = arith.constant 0 : index
      %c0_35 = arith.constant 0 : index
      %c0_36 = arith.constant 0 : index
      %60 = vector.load %arg5[%c0_34, %c0_35, %c0_36] : memref<1x4x1xf32, #tpu.memory_space<vmem>>, vector<1x4x1xf32>
      tpu.vector_store %arg5[%c0_34, %c0_35, %c0_36], %59 {strides = array<i32>} : memref<1x4x1xf32, #tpu.memory_space<vmem>>, vector<1x4x1xf32>,
      %cst_37 = arith.constant 0.000000e+00 : f32
      %61 = vector.broadcast %cst_37 : f32 to vector<1x4x1xf32>
      %c0_38 = arith.constant 0 : index
      %c0_39 = arith.constant 0 : index
      %c0_40 = arith.constant 0 : index
      %62 = vector.load %arg6[%c0_38, %c0_39, %c0_40] : memref<1x4x1xf32, #tpu.memory_space<vmem>>, vector<1x4x1xf32>
      tpu.vector_store %arg6[%c0_38, %c0_39, %c0_40], %61 {strides = array<i32>} : memref<1x4x1xf32, #tpu.memory_space<vmem>>, vector<1x4x1xf32>,
    } else {
    }
    %c0 = arith.constant 0 : index
    %c0_1 = arith.constant 0 : index
    %c0_2 = arith.constant 0 : index
    %3 = vector.load %arg2[%c0, %c0_1, %c0_2] : memref<1x4x256xf32, #tpu.memory_space<vmem>>, vector<1x4x256xf32>
    %4 = vector.shape_cast %3 : vector<1x4x256xf32> to vector<4x256xf32>
    %c0_3 = arith.constant 0 : index
    %c0_4 = arith.constant 0 : index
    %c0_5 = arith.constant 0 : index
    %5 = vector.load %arg3[%c0_3, %c0_4, %c0_5] : memref<1x1x256xi32, #tpu.memory_space<vmem>>, vector<1x1x256xi32>
    %6 = vector.shape_cast %5 : vector<1x1x256xi32> to vector<1x256xi32>
    %7 = tpu.iota {dimensions = array<i32: 0>} : vector<4x256xi32>
    %8 = vector.broadcast %6 : vector<1x256xi32> to vector<4x256xi32>
    %9 = arith.cmpi eq, %7, %8 : vector<4x256xi32>
    %10 = arith.extui %9 : vector<4x256xi1> to vector<4x256xi32>
    %11 = arith.sitofp %10 : vector<4x256xi32> to vector<4x256xf32>
    %cst = arith.constant dense<0xFF800000> : vector<256xf32>
    %12 = vector.multi_reduction <maximumf>, %4, %cst [0] : vector<4x256xf32> to vector<256xf32>
    %13 = vector.shape_cast %12 : vector<256xf32> to vector<1x256xf32>
    %14 = vector.broadcast %13 : vector<1x256xf32> to vector<4x256xf32>
    %15 = arith.subf %4, %14 : vector<4x256xf32>
    %16 = math.exp %15 : vector<4x256xf32>
    %cst_6 = arith.constant dense<0.000000e+00> : vector<256xf32>
    %17 = vector.multi_reduction <add>, %16, %cst_6 [0] : vector<4x256xf32> to vector<256xf32>
    %18 = vector.shape_cast %17 : vector<256xf32> to vector<1x256xf32>
    %19 = vector.broadcast %13 : vector<1x256xf32> to vector<4x256xf32>
    %20 = arith.subf %4, %19 : vector<4x256xf32>
    %21 = math.log %18 : vector<1x256xf32>
    %22 = vector.broadcast %21 : vector<1x256xf32> to vector<4x256xf32>
    %23 = arith.subf %20, %22 : vector<4x256xf32>
    %24 = tpu.reciprocal %18 : vector<1x256xf32> -> vector<1x256xf32>
    %25 = vector.broadcast %24 : vector<1x256xf32> to vector<4x256xf32>
    %26 = arith.mulf %16, %25 : vector<4x256xf32>
    %c0_7 = arith.constant 0 : index
    %c0_8 = arith.constant 0 : index
    %c0_9 = arith.constant 0 : index
    %27 = vector.load %arg4[%c0_7, %c0_8, %c0_9] : memref<1x4x1xf32, #tpu.memory_space<vmem>>, vector<1x4x1xf32>
    %28 = vector.shape_cast %27 : vector<1x4x1xf32> to vector<4x1xf32>
    %cst_10 = arith.constant 0.000000e+00 : f32
    %29 = vector.broadcast %cst_10 : f32 to vector<4x256xf32>
    %30 = arith.subf %29, %23 : vector<4x256xf32>
    %31 = arith.mulf %11, %30 : vector<4x256xf32>
    %cst_11 = arith.constant dense<0.000000e+00> : vector<4xf32>
    %32 = vector.multi_reduction <add>, %31, %cst_11 [1] : vector<4x256xf32> to vector<4xf32>
    %33 = vector.shape_cast %32 : vector<4xf32> to vector<4x1xf32>
    %34 = arith.addf %28, %33 : vector<4x1xf32>
    %c0_12 = arith.constant 0 : index
    %c0_13 = arith.constant 0 : index
    %c0_14 = arith.constant 0 : index
    %35 = vector.load %arg4[%c0_12, %c0_13, %c0_14] : memref<1x4x1xf32, #tpu.memory_space<vmem>>, vector<1x4x1xf32>
    %36 = vector.shape_cast %35 : vector<1x4x1xf32> to vector<4x1xf32>
    %37 = vector.shape_cast %34 : vector<4x1xf32> to vector<1x4x1xf32>
    tpu.vector_store %arg4[%c0_12, %c0_13, %c0_14], %37 {strides = array<i32>} : memref<1x4x1xf32, #tpu.memory_space<vmem>>, vector<1x4x1xf32>,
    %c0_15 = arith.constant 0 : index
    %c0_16 = arith.constant 0 : index
    %c0_17 = arith.constant 0 : index
    %38 = vector.load %arg5[%c0_15, %c0_16, %c0_17] : memref<1x4x1xf32, #tpu.memory_space<vmem>>, vector<1x4x1xf32>
    %39 = vector.shape_cast %38 : vector<1x4x1xf32> to vector<4x1xf32>
    %40 = arith.mulf %26, %11 : vector<4x256xf32>
    %cst_18 = arith.constant dense<0.000000e+00> : vector<4xf32>
    %41 = vector.multi_reduction <add>, %40, %cst_18 [1] : vector<4x256xf32> to vector<4xf32>
    %42 = vector.shape_cast %41 : vector<4xf32> to vector<4x1xf32>
    %43 = arith.addf %39, %42 : vector<4x1xf32>
    %c0_19 = arith.constant 0 : index
    %c0_20 = arith.constant 0 : index
    %c0_21 = arith.constant 0 : index
    %44 = vector.load %arg5[%c0_19, %c0_20, %c0_21] : memref<1x4x1xf32, #tpu.memory_space<vmem>>, vector<1x4x1xf32>
    %45 = vector.shape_cast %44 : vector<1x4x1xf32> to vector<4x1xf32>
    %46 = vector.shape_cast %43 : vector<4x1xf32> to vector<1x4x1xf32>
    tpu.vector_store %arg5[%c0_19, %c0_20, %c0_21], %46 {strides = array<i32>} : memref<1x4x1xf32, #tpu.memory_space<vmem>>, vector<1x4x1xf32>,
    %c0_22 = arith.constant 0 : index
    %c0_23 = arith.constant 0 : index
    %c0_24 = arith.constant 0 : index
    %47 = vector.load %arg6[%c0_22, %c0_23, %c0_24] : memref<1x4x1xf32, #tpu.memory_space<vmem>>, vector<1x4x1xf32>
    %48 = vector.shape_cast %47 : vector<1x4x1xf32> to vector<4x1xf32>
    %49 = arith.mulf %26, %26 : vector<4x256xf32>
    %50 = arith.addf %49, %11 : vector<4x256xf32>
    %cst_25 = arith.constant dense<0.000000e+00> : vector<4xf32>
    %51 = vector.multi_reduction <add>, %50, %cst_25 [1] : vector<4x256xf32> to vector<4xf32>
    %52 = vector.shape_cast %51 : vector<4xf32> to vector<4x1xf32>
    %53 = arith.addf %48, %52 : vector<4x1xf32>
    %c0_26 = arith.constant 0 : index
    %c0_27 = arith.constant 0 : index
    %c0_28 = arith.constant 0 : index
    %54 = vector.load %arg6[%c0_26, %c0_27, %c0_28] : memref<1x4x1xf32, #tpu.memory_space<vmem>>, vector<1x4x1xf32>
    %55 = vector.shape_cast %54 : vector<1x4x1xf32> to vector<4x1xf32>
    %56 = vector.shape_cast %53 : vector<4x1xf32> to vector<1x4x1xf32>
    tpu.vector_store %arg6[%c0_26, %c0_27, %c0_28], %56 {strides = array<i32>} : memref<1x4x1xf32, #tpu.memory_space<vmem>>, vector<1x4x1xf32>,
    return
  }
  func.func @transform_0(%arg0: i32, %arg1: i32) -> (i32, i32, i32) {
    %c0_i32 = arith.constant 0 : i32
    %c0_i32_0 = arith.constant 0 : i32
    return %arg0, %c0_i32, %arg1 : i32, i32, i32
  }
  func.func @transform_1(%arg0: i32, %arg1: i32) -> (i32, i32, i32) {
    %c0_i32 = arith.constant 0 : i32
    %c0_i32_0 = arith.constant 0 : i32
    return %arg0, %c0_i32, %arg1 : i32, i32, i32
  }
  func.func @transform_2(%arg0: i32, %arg1: i32) -> (i32, i32, i32) {
    %c0_i32 = arith.constant 0 : i32
    %c0_i32_0 = arith.constant 0 : i32
    %c0_i32_1 = arith.constant 0 : i32
    return %arg0, %c0_i32, %c0_i32_0 : i32, i32, i32
  }
  func.func @transform_3(%arg0: i32, %arg1: i32) -> (i32, i32, i32) {
    %c0_i32 = arith.constant 0 : i32
    %c0_i32_0 = arith.constant 0 : i32
    %c0_i32_1 = arith.constant 0 : i32
    return %arg0, %c0_i32, %c0_i32_0 : i32, i32, i32
  }
  func.func @transform_4(%arg0: i32, %arg1: i32) -> (i32, i32, i32) {
    %c0_i32 = arith.constant 0 : i32
    %c0_i32_0 = arith.constant 0 : i32
    %c0_i32_1 = arith.constant 0 : i32
    return %arg0, %c0_i32, %c0_i32_0 : i32, i32, i32
  }
}

</mosaic_0001>

<bundles_post_ra>
// kernel: tpu_custom_call.1
= control target key start
LH: loop header
LB: loop body
LE: loop exit
PB: predicated region body
PF: predicated region fallthrough
CT: control target
= control target key end

     0   :  { %10 = vsyncpa [#allocation3], 0  ;;  %s989_s0 = inlined_call_operand.hbm [shape: f32[2,4,256], index: 0, kind: input, shape index: {}]   ;;  %s990_s1 = inlined_call_operand.hbm [shape: s32[2,1,256], index: 1, kind: input, shape index: {}]   ;;  %s991_s2 = inlined_call_operand.vmem [shape: f32[2,4,1], index: 2, kind: output, shape index: {0}]   ;;  %s992_s3 = inlined_call_operand.vmem [shape: f32[2,4,1], index: 3, kind: output, shape index: {1}]   ;;  %s993_s4 = inlined_call_operand.vmem [shape: f32[2,4,1], index: 4, kind: output, shape index: {2}]  }
   0x1   :  { %12 = vsyncpa [#allocation3 + $0x1], 0 }
   0x2   :  { %13 = vsyncpa [#allocation5], 0 }
   0x3   :  { %15 = vsyncpa [#allocation5 + $0x1], 0  ;;  %s821_s15 = smov 0   ;;  %s823_s16 = smov 0  }
   0x4   :  { %s825_s17 = smov 0   ;;  %s827_s18 = smov 0  }
   0x5   :  { %s829_s19 = smov 0   ;;  %s831_s20 = smov 0  }
   0x6 LB: > { %s587_s21 = sadd.s32 4294967295, %s791_s20   ;;  %s33_s22 = sadd.s32 1, %s787_s19  ;;  %s791_s20 = sphi %s831_s20, %s21_s20   ;;  %s787_s19 = sphi %s829_s19, %s1002_s19   ;;  %s783_s18 = sphi %s827_s18, %s1001_s18   ;;  %s779_s17 = sphi %s825_s17, %s1000_s17   ;;  %s775_s16 = sphi %s823_s16, %s999_s16   ;;  %s771_s15 = sphi %s821_s15, %s998_s15  }
   0x7   : > { %p35_p0 = scmp.ge.s32.totalorder %s33_s22, 2  ;;  %s42_s23 = sadd.s32 1, %s779_s17 }
   0x8   : > { %p49_p1 = scmp.ne.s32.totalorder %s779_s17, %s775_s16  ;;  %p50_p2 = scmp.eq.s32.totalorder %s791_s20, 0 }
   0x9   : > { %s1004_s22 = smov (%p35_p0, %s33_s22), 0  ;;  %p55_p4 = scmp.ne.s32.totalorder %s775_s16, %s771_s15 }
   0xa   : > { %p857_p3 = por %p50_p2, %p49_p1  ;;  %s37_s25 = ssub.s32 %s787_s19, %s1004_s22 }
   0xb   : > { %p56_p5 = scmp.eq.s32.totalorder %s587_s21, 0  ;;  %p40_p6 = scmp.eq.s32.totalorder %s37_s25, 0 }
   0xc   : > { %p620_p8 = scmp.lt.s32.totalorder %s791_s20, 2  ;;  %s873_s28 = sand.u32 1, %s779_s17  }
   0xd   : > { %p864_p7 = por %p56_p5, %p55_p4  ;;  %s607_s29 = sshll.u32 %s787_s19, 7 }
   0xe   : > { %s870_s27 = scalar_select %p40_p6, %s779_s17, %s42_s23  }
   0xf   : > { %s591_s30 = sshll.u32 %s873_s28, 3  ;;  %s197_s7 = scalar_lea.hbm %s989_s0, %s607_s29 }
  0x10   : > { %s189_s8 = scalar_lea.vmem [#allocation2], %s591_s30  ;;  %p882_p9 = pnand %p620_p8, %p857_p3 }
  0x11   : > { %s199_s9 = sshll.u32 %s189_s8, 4  ;;  %p597_p10 = scmp.ge.s32.totalorder %s791_s20, 1  ;;  %s200_s9 = int_to_ptr.vmem [resolvable:$true] %s199_s9 }
  0x12   : > { %p225_p11 = scmp.lt.s32.totalorder %s791_s20, 3  ;;  %s186_s11 = scalar_lea.sflag [#allocation3], %s873_s28 }
  0x13   : > { %p683_p12 = pneg %p882_p9  ;;  %s694_s12 = scalar_lea.vmem %s200_s9, 128 }
  0x14   : > { %p695_p13 = scmp.ne.s32.totalorder %s200_s9, %s694_s12  ;;  %s793_s13 = smov [#allocation2]  }
  0x15   : > { %s699_s14 = sshll.u32 %s793_s13, 4  ;;  %s700_s14 = int_to_ptr.vmem [resolvable:$false] %s699_s14 }
  0x16   : > { %p697_p0 = pnand %p695_p13, %p683_p12  ;;  %s701_s15 = scalar_lea.vmem %s700_s14, 256 }
  0x17   : > { %p702_p2 = scmp.lt.s32.totalorder %s200_s9, %s700_s14  ;;  %p703_p3 = scmp.lt.s32.totalorder %s701_s15, %s694_s12 }
  0x18   : > { %p698_p1 = pneg %p697_p0 }
  0x19   : > { %p704_p4 = por %p703_p3, %p702_p2 }
  0x1b   : > { %p705_p5 = pnand %p704_p4, %p698_p1 }
  0x1d   : > { %708 = shalt.err (!%p705_p5)
}
  0x1e   : > { %616 = dma.hbm_to_vmem [thread:$0]  (!%p882_p9), %s197_s7, 128, %s200_s9, %s186_s11  }
  0x1f   : > { %p900_p6 = pnand %p597_p10, %p225_p11  ;;  %s594_s23 = sshll.u32 %s873_s28, 1 }
  0x20   : > { %s608_s24 = sshll.u32 %s787_s19, 5  ;;  %s210_s5 = scalar_lea.vmem [#allocation4], %s594_s23 }
  0x21   : > { %s218_s30 = scalar_lea.hbm %s990_s1, %s608_s24  ;;  %s220_s6 = sshll.u32 %s210_s5, 4  ;;  %s221_s6 = int_to_ptr.vmem [resolvable:$true] %s220_s6 }
  0x22   : > { %s207_s8 = scalar_lea.sflag [#allocation5], %s873_s28  ;;  %s722_s12 = scalar_lea.vmem %s221_s6, 32 }
  0x23   : > { %p723_p8 = scmp.ne.s32.totalorder %s221_s6, %s722_s12  ;;  %s794_s7 = smov [#allocation4]  }
  0x24   : > { %s727_s9 = sshll.u32 %s794_s7, 4  ;;  %s728_s9 = int_to_ptr.vmem [resolvable:$false] %s727_s9 }
  0x25   : > { %p725_p13 = pnand %p723_p8, %p683_p12  ;;  %s729_s11 = scalar_lea.vmem %s728_s9, 64 }
  0x26   : > { %p730_p10 = scmp.lt.s32.totalorder %s221_s6, %s728_s9  ;;  %p731_p11 = scmp.lt.s32.totalorder %s729_s11, %s722_s12 }
  0x27   : > { %p726_p0 = pneg %p725_p13 }
  0x28   : > { %p732_p1 = por %p731_p11, %p730_p10 }
  0x2a   : > { %p733_p2 = pnand %p732_p1, %p726_p0 }
  0x2c   : > { %736 = shalt.err (!%p733_p2)
}
  0x2d   : > { %619 = dma.hbm_to_vmem [thread:$0]  (!%p882_p9), %s218_s30, 32, %s221_s6, %s207_s8  }
  0x2e   : > { %229 = sbr.rel (%p900_p6) target bundleno = 280 (0x118), region = 28  ;;  %s231_s28 = sand.u32 (!%p900_p6), 1, %s775_s16  }
  0x2f   : > { %s598_s13 = sshll.u32 (!%p900_p6), %s231_s28, 3  ;;  %s232_s14 = scalar_lea.sflag (!%p900_p6), [#allocation3], %s231_s28 }
  0x30   : > { %s235_s15 = scalar_lea.vmem (!%p900_p6), [#allocation2], %s598_s13 }
  0x33   : > { %762 = dma.done.wait (%p864_p7), %s232_s14, 128  }
  0x34   : > { %764 = vsyncadd (%p864_p7), %s232_s14, 4294967168  ;;  %s599_s23 = sshll.u32 %s231_s28, 1  ;;  %s241_s24 = scalar_lea.sflag [#allocation5], %s231_s28 }
  0x35   : > { %s922_s25 = scalar_lea.vmem [#allocation4], %s599_s23 }
  0x36   : > { %766 = dma.done.wait (%p864_p7), %s241_s24, 32  }
  0x37   : > { %768 = vsyncadd (%p864_p7), %s241_s24, 4294967264  ;;  %p283_p9 = scmp.lt.s32.totalorder %s783_s18, 1  ;;  %vm299_vm0 = vcmask 3072   ;;  %vm324_vm1 = vcmask 1043456   ;;  %v795_v0 = vmov 0.0   ;;  %v303_v1 = vld [vmem:[%s235_s15] sm:$0xff]  ;;  %v305_v31 = vlaneseq }
  0x38   : > { %v322_v2 = vcombine.high %v303_v1, %v303_v1  ;;  %v325_v3 = vsel %vm324_vm1, %v303_v1, -inf  ;;  %v304_v40 = vld [vmem:[%s922_s25] sm:$0x3] }
  0x39   : > { %s1006_s18 = smov (!%p283_p9, %s783_s18), 1  ;;  %v326_v4 = vrot.slane %v325_v3, 4  ;;  %v306_v36 = vshrl.u32 %v305_v31, 7 }
  0x3a   : > { %s930_s10 = sshll.u32 %s1006_s18, 2  ;;  %v332_v5 = vsel %vm324_vm1, %v322_v2, -inf }
  0x3b   : > { %s936_s30 = scalar_lea.vmem %s991_s2, %s930_s10  ;;  %v327_v6 = vmax.f32 %v325_v3, %v326_v4  ;;  %v333_v7 = vrot.slane %v332_v5, 4  ;;  %v309_v38 = vsub.s32 0, %v306_v36  ;;  %v313_v39 = vsub.s32 1, %v306_v36  ;;  %s294_s5 = scalar_lea.vmem %s993_s4, %s930_s10 }
  0x3c   : > { %300 = vst.msk [vmem:[%s936_s30] sm:$0xf] %vm299_vm0, %v795_v0  ;;  %s290_s12 = scalar_lea.vmem %s992_s3, %s930_s10  ;;  %302 = vst.msk [vmem:[%s294_s5] sm:$0xf] %vm299_vm0, %v795_v0 }
  0x3d   : > { %v328_v8 = vrot.slane %v327_v6, 2  ;;  %v334_v9 = vmax.f32 %v332_v5, %v333_v7  ;;  %v310_v41 = vrot.slane %v304_v40, %v309_v38  ;;  %v314_v42 = vrot.slane %v304_v40, %v313_v39  ;;  %301 = vst.msk [vmem:[%s290_s12] sm:$0xf] %vm299_vm0, %v795_v0 }
  0x3f   : > { %v329_v10 = vmax.f32 %v327_v6, %v328_v8  ;;  %v335_v11 = vrot.slane %v334_v9, 2  ;;  %vm315_vm2 = vcmp.eq.s32.totalorder %v306_v36, %v310_v41  ;;  %vm316_vm3 = vcmp.eq.s32.totalorder %v306_v36, %v314_v42 }
  0x40   : > { %v603_v45 = vsel %vm315_vm2, 1.0, %v795_v0  ;;  %v604_v46 = vsel %vm316_vm3, 1.0, %v795_v0 }
  0x41   : > { %v330_v12 = vrot.slane %v329_v10, 1  ;;  %v336_v13 = vmax.f32 %v334_v9, %v335_v11  ;;  %v397_v52 = vcombine.low %v603_v45, %v604_v46 }
  0x43   : > { %v331_v14 = vmax.f32 %v329_v10, %v330_v12  ;;  %v337_v15 = vrot.slane %v336_v13, 1  ;;  %v410_v11 = vld [vmem:[%s294_s5] sm:$0xf] }
  0x44   : > { %v379_v12 = vld [vmem:[%s936_s30] sm:$0xf] }
  0x45   : > { %v338_v16 = vmax.f32 %v336_v13, %v337_v15 }
  0x47   : > { %v341_v17 = vcombine.low %v331_v14, %v338_v16 }
  0x49   : > { %v343_v18 = vsub.f32 %v303_v1, %v341_v17  ;;  %v394_v17 = vld [vmem:[%s290_s12] sm:$0xf] }
  0x4b   : > { %v344_v19 = vmul.f32 1.442695, %v343_v18 }
  0x4d   : > { %671 = vpow2.f32 %v344_v19 }
  0x5a   : > { %v672_v20 = vpop.eup %671 }
  0x5b   : > { %v347_v21 = vcombine.high %v672_v20, %v672_v20  ;;  %v349_v22 = vsel %vm324_vm1, %v672_v20, 0.0 }
  0x5c   : > { %v350_v23 = vrot.slane %v349_v22, 4 }
  0x5d   : > { %v356_v24 = vsel %vm324_vm1, %v347_v21, 0.0 }
  0x5e   : > { %v351_v25 = vadd.f32 %v350_v23, %v349_v22  ;;  %v357_v26 = vrot.slane %v356_v24, 4 }
  0x60   : > { %v352_v27 = vrot.slane %v351_v25, 2  ;;  %v358_v28 = vadd.f32 %v357_v26, %v356_v24 }
  0x62   : > { %v353_v29 = vadd.f32 %v352_v27, %v351_v25  ;;  %v359_v30 = vrot.slane %v358_v28, 2 }
  0x64   : > { %v354_v32 = vrot.slane %v353_v29, 1  ;;  %v360_v33 = vadd.f32 %v359_v30, %v358_v28 }
  0x66   : > { %v355_v34 = vadd.f32 %v354_v32, %v353_v29  ;;  %v361_v35 = vrot.slane %v360_v33, 1 }
  0x68   : > { %v362_v37 = vadd.f32 %v361_v35, %v360_v33  ;;  %673 = vlog2.f32 %v355_v34 }
  0x69   : > { %675 = vrcp.f32 %v355_v34 }
  0x6a   : > { %677 = vlog2.f32 %v362_v37 }
  0x6b   : > { %679 = vrcp.f32 %v362_v37 }
  0x75   : > { %v674_v43 = vpop.eup %673 }
  0x76   : > { %v676_v44 = vpop.eup %675  ;;  %v364_v47 = vmul.f32 0.6931472, %v674_v43 }
  0x77   : > { %v678_v48 = vpop.eup %677 }
  0x78   : > { %v680_v49 = vpop.eup %679  ;;  %v366_v50 = vmul.f32 0.6931472, %v678_v48 }
  0x79   : > { %v376_v51 = vcombine.low %v676_v44, %v680_v49 }
  0x7a   : > { %v369_v53 = vcombine.low %v364_v47, %v366_v50 }
  0x7b   : > { %v378_v54 = vmul.f32 %v672_v20, %v376_v51 }
  0x7c   : > { %v371_v55 = vsub.f32 %v343_v18, %v369_v53 }
  0x7d   : > { %v411_v56 = vmul.f32 %v378_v54, %v378_v54  ;;  %v399_v57 = vmul.f32 %v397_v52, %v378_v54 }
  0x7e   : > { %v380_v58 = vsub.f32 0.0, %v371_v55 }
  0x7f   : > { %v412_v59 = vadd.f32 %v411_v56, %v397_v52  ;;  %v401_v62 = vcombine.high %v399_v57, %v399_v57  ;;  %v403_v7 = vsel %vm324_vm1, %v399_v57, 0.0 }
  0x80   : > { %v382_v60 = vcombine.high %v380_v58, %v380_v58  ;;  %v384_v61 = vmul.f32 %v603_v45, %v380_v58 }
  0x81   : > { %v414_v63 = vcombine.high %v412_v59, %v412_v59  ;;  %v416_v1 = vsel %vm324_vm1, %v412_v59, 0.0  ;;  %v404_v8 = vsel %vm324_vm1, %v401_v62, 0.0 }
  0x82   : > { %v385_v2 = vmul.f32 %v604_v46, %v382_v60  ;;  %v386_v3 = vsel %vm324_vm1, %v384_v61, 0.0  ;;  %v405_v10 = vadd.f32 %v404_v8, %v403_v7 }
  0x83   : > { %v417_v4 = vsel %vm324_vm1, %v414_v63, 0.0 }
  0x84   : > { %v387_v5 = vsel %vm324_vm1, %v385_v2, 0.0  ;;  %v418_v6 = vadd.f32 %v417_v4, %v416_v1 }
  0x85   : > { %v388_v9 = vadd.f32 %v387_v5, %v386_v3 }
  0x86   : > { %419 = vadd.xlane.f32.xlu1 %v418_v6 }
  0x87   : > { %389 = vadd.xlane.f32.xlu0 %v388_v9 }
  0x8b   : > { %406 = vadd.xlane.f32.xlu0 %v405_v10 }
 0x10f   : > { %v420_v13 = vpop.xlane.xlu1 %419 }
 0x110   : > { %v390_v14 = vpop.xlane.xlu0 %389  ;;  %v421_v15 = vadd.f32 %v420_v13, %v410_v11 }
 0x111   : > { %v391_v16 = vadd.f32 %v390_v14, %v379_v12 }
 0x112   : > { %422 = vst.msk [vmem:[%s294_s5] sm:$0xf] %vm299_vm0, %v421_v15 }
 0x113   : > { %393 = vst.msk [vmem:[%s936_s30] sm:$0xf] %vm299_vm0, %v391_v16 }
 0x114   : > { %v407_v18 = vpop.xlane.xlu0 %406 }
 0x115   : > { %v408_v19 = vadd.f32 %v407_v18, %v394_v17 }
 0x117   : > { %409 = vst.msk [vmem:[%s290_s12] sm:$0xf] %vm299_vm0, %v408_v19 }
 0x118 PF: > { %s21_s20 = sadd.s32 1, %s791_s20   ;;  %s998_s15 = smov %s775_s16 }
 0x119   : > { %p18_p7 = scmp.ge.s32.totalorder %s21_s20, 4   ;;  %s999_s16 = smov %s779_s17 }
 0x11a   : > { %s1000_s17 = smov %s870_s27  ;;  %s1001_s18 = smov %s787_s19 }
 0x11b   : > { %s1002_s19 = smov %s1004_s22  ;;  %20 = sbr.rel (!%p18_p7) target bundleno = 6 (0x6), region = 109 }
 0x120   :  { %470 = vsyncpa [#allocation3], 1 }
 0x121   :  { %472 = vsyncpa [#allocation3 + $0x1], 1 }
 0x122   :  { %473 = vsyncpa [#allocation5], 1 }
 0x123   :  { %475 = vsyncpa [#allocation5 + $0x1], 1 }

</bundles_post_ra>
